<compile_context>
chip_gen: v6e
topology: v6e:2x2x1
jax: 0.10.0
libtpu: 0.0.40
codegen_flags: <defaults>
</compile_context>

<pallas_src>
import jax
import jax.numpy as jnp
from jax.experimental import pallas as pl
from jax.experimental.pallas import tpu as pltpu


# --------------------------------------------------------------------------
# Kernel
# --------------------------------------------------------------------------
def _fuser_kernel(g16_ref, g8_ref, g4_ref,
                  w16_ref, b16_ref, w8_ref, b8_ref, w4_ref, b4_ref,
                  out_ref):
    # g16_ref: [1, TQ, C16]            (channels-last)
    # g8_ref : [1, TQ, 4*C8]           (space-to-depth: 2x2 window on K axis)
    # g4_ref : [1, TQ, 16*C4]          (space-to-depth: 4x4 window on K axis)
    # w*_ref : [K, hidden]             (1/win pool scale folded in; w8/w4
    #                                   tiled win-times along K)
    # b*_ref : [1, hidden]  (f32)
    # out_ref: [1, TQ, 3*hidden]
    hidden = b16_ref.shape[-1]

    # ---- g16 branch: plain 1x1 conv --------------------------------------
    y16 = jnp.dot(g16_ref[0], w16_ref[...],
                  preferred_element_type=jnp.float32) + b16_ref[...]
    out_ref[0, :, 0:hidden] = y16.astype(out_ref.dtype)

    # ---- g8 branch: 2x2 avg pool + 1x1 conv, fused into one MXU matmul ----
    # The window lives on K, so the MXU's f32 K-accumulation performs the
    # pooling (scale already folded into w8) — no VPU adds, no cast passes.
    y8 = jnp.dot(g8_ref[0], w8_ref[...],
                 preferred_element_type=jnp.float32) + b8_ref[...]
    out_ref[0, :, hidden:2 * hidden] = y8.astype(out_ref.dtype)

    # ---- g4 branch: 4x4 avg pool + 1x1 conv, fused into one MXU matmul ----
    y4 = jnp.dot(g4_ref[0], w4_ref[...],
                 preferred_element_type=jnp.float32) + b4_ref[...]
    out_ref[0, :, 2 * hidden:3 * hidden] = y4.astype(out_ref.dtype)


# --------------------------------------------------------------------------
# Wrapper helpers
# --------------------------------------------------------------------------
def _space_to_depth(x_nchw, r):
    """Layout glue: NCHW -> [N, (H/r)*(W/r), r*r*C] (window folded onto K)."""
    n, c, h, w = x_nchw.shape
    ht, wt = h // r, w // r
    x = jnp.transpose(x_nchw, (0, 2, 3, 1))            # N,H,W,C
    x = x.reshape(n, ht, r, wt, r, c)
    x = jnp.transpose(x, (0, 1, 3, 2, 4, 5))            # N,Ht,Wt,r,r,C
    return x.reshape(n, ht * wt, r * r * c)


def _pick_tile(hw, tq_max, min_steps=1):
    """Spatial tile: divisor of hw, multiple of 8 (prefer multiples of 128),
    <= tq_max, leaving at least `min_steps` spatial grid steps if possible."""
    cands = [t for t in range(8, min(hw, tq_max) + 1, 8) if hw % t == 0]
    if not cands:
        # TODO(synk): odd H16*W16 with no multiple-of-8 divisor falls back to a
        # single whole-image block; a pl.cdiv grid with a masked spatial tail
        # would bound VMEM for that case.
        return hw
    ok = [t for t in cands if hw // t >= min_steps] or cands
    pref = [t for t in ok if t % 128 == 0]
    return max(pref) if pref else max(ok)


def _default_tuning():
    """Generation-aware (tq_max, vmem_limit_bytes):
       v5e/v6e (128 MiB VMEM): TQ<=1024, 64 MiB scoped limit;
       v7x     (64  MiB VMEM): TQ<=512,  48 MiB scoped limit."""
    tq_max, vmem_limit = 512, 32 * 1024 * 1024          # safe fallback
    try:
        cap = pltpu.get_tpu_info().vmem_capacity_bytes
        if cap >= 96 * 1024 * 1024:
            tq_max, vmem_limit = 1024, 64 * 1024 * 1024
        else:
            tq_max, vmem_limit = 512, 48 * 1024 * 1024
    except Exception:
        pass
    return tq_max, vmem_limit


# --------------------------------------------------------------------------
# Wrapper
# --------------------------------------------------------------------------
def feature_fuser(g16, g8, g4, params, *,
                  compute_dtype=jnp.bfloat16,
                  tq_max=None,
                  vmem_limit_bytes=None,
                  nhwc_output=False):
    """Inputs NCHW; returns NCHW [N, 3*hidden, H16, W16] (NHWC if requested)."""
    n, c16, ho, wo = g16.shape
    c8 = g8.shape[1]
    c4 = g4.shape[1]
    hw = ho * wo
    hidden = params["w16"].shape[1]
    out_dtype = g16.dtype

    auto_tq, auto_vmem = _default_tuning()
    if tq_max is None:
        tq_max = auto_tq
    if vmem_limit_bytes is None:
        vmem_limit_bytes = auto_vmem

    # ---- host-side parameter prep (weight-sized, cheap) -------------------
    # conv(mean_win(x)) == space_to_depth(x) @ tile(w / win, win) + b:
    # the 1/win scale folds into the weights, the window sum becomes MXU-K.
    w16 = params["w16"].astype(compute_dtype)                                   # [C16,  hid]
    w8t = jnp.tile(params["w8"] * (1.0 / 4.0), (4, 1)).astype(compute_dtype)    # [4*C8, hid]
    w4t = jnp.tile(params["w4"] * (1.0 / 16.0), (16, 1)).astype(compute_dtype)  # [16*C4,hid]
    b16 = params["b16"].astype(jnp.float32)
    b8 = params["b8"].astype(jnp.float32)
    b4 = params["b4"].astype(jnp.float32)

    # ---- layout glue (NCHW -> channels-last space-to-depth) ---------------
    # NOTE: if the producer can emit this layout (or NHWC) in bf16 directly,
    # delete these transposes — they re-stream the largest tensors through
    # HBM before the kernel runs.
    g16_f = _space_to_depth(g16, 1).astype(compute_dtype)   # [N, HW, C16]
    g8_f = _space_to_depth(g8, 2).astype(compute_dtype)     # [N, HW, 4*C8]
    g4_f = _space_to_depth(g4, 4).astype(compute_dtype)     # [N, HW, 16*C4]

    k16, k8, k4 = c16, 4 * c8, 16 * c4                      # no channel padding

    # Keep the grid non-degenerate (>= 2 total steps) so both v7x TCs work.
    tq = _pick_tile(hw, tq_max, min_steps=2 if n == 1 else 1)

    out = pl.pallas_call(
        _fuser_kernel,
        out_shape=jax.ShapeDtypeStruct((n, hw, 3 * hidden), out_dtype),
        grid_spec=pltpu.PrefetchScalarGridSpec(
            num_scalar_prefetch=0,
            grid=(n, hw // tq),
            in_specs=[
                # Activations: last dim = full (unpadded) channel extent, so
                # the blocks are contiguous HBM bursts and Mosaic pads only
                # inside VMEM/MXU (legal: block dim == full array dim).
                pl.BlockSpec((1, tq, k16), lambda i, q: (i, q, 0)),
                pl.BlockSpec((1, tq, k8), lambda i, q: (i, q, 0)),
                pl.BlockSpec((1, tq, k4), lambda i, q: (i, q, 0)),
                # Weights / biases: constant block index -> resident in VMEM,
                # no re-DMA across grid steps.
                pl.BlockSpec((k16, hidden), lambda i, q: (0, 0)),
                pl.BlockSpec((1, hidden), lambda i, q: (0, 0)),
                pl.BlockSpec((k8, hidden), lambda i, q: (0, 0)),
                pl.BlockSpec((1, hidden), lambda i, q: (0, 0)),
                pl.BlockSpec((k4, hidden), lambda i, q: (0, 0)),
                pl.BlockSpec((1, hidden), lambda i, q: (0, 0)),
            ],
            out_specs=pl.BlockSpec((1, tq, 3 * hidden), lambda i, q: (i, q, 0)),
        ),
        compiler_params=pltpu.CompilerParams(
            dimension_semantics=("parallel", "parallel"),
            vmem_limit_bytes=vmem_limit_bytes),
    )(g16_f, g8_f, g4_f, w16, b16, w8t, b8, w4t, b4)

    out = out.reshape(n, ho, wo, 3 * hidden)
    if nhwc_output:
        return out
    # NCHW to match the PyTorch module.  Review item #10: this is a full extra
    # HBM round-trip of the result — keep the consumer NHWC when possible.
    return jnp.transpose(out, (0, 3, 1, 2))


# --------------------------------------------------------------------------
# Plain-JAX reference (matches the PyTorch forward)
# --------------------------------------------------------------------------
def _reference(g16, g8, g4, params):
    def conv1x1(x, w, b):
        return jnp.einsum('nchw,cd->ndhw', x, w) + b[0][None, :, None, None]

    def area_down(x, r):
        n, c, h, w = x.shape
        return x.reshape(n, c, h // r, r, w // r, r).mean(axis=(3, 5))

    y16 = conv1x1(g16, params["w16"], params["b16"])
    y8 = conv1x1(area_down(g8, 2), params["w8"], params["b8"])
    y4 = conv1x1(area_down(g4, 4), params["w4"], params["b4"])
    return jnp.concatenate([y16, y8, y4], axis=1)


if __name__ == "__main__":
    key = jax.random.PRNGKey(0)
    ks = jax.random.split(key, 6)

    # Small stand-ins for production (g_dims=(384, 256, 257), hidden_dim=256).
    # NOTE: hidden=8 exercises masked channel-slice stores — correctness-only
    # shapes; do not benchmark with them (production hidden=256 is lane dense).
    n = 2
    g_dims = (24, 16, 17)
    hidden = 8
    H16 = W16 = 4

    g16 = jax.random.normal(ks[0], (n, g_dims[0], H16, W16), jnp.float32)
    g8 = jax.random.normal(ks[1], (n, g_dims[1], 2 * H16, 2 * W16), jnp.float32)
    g4 = jax.random.normal(ks[2], (n, g_dims[2], 4 * H16, 4 * W16), jnp.float32)

    def init_conv1x1(k, cin, cout):
        kw, kb = jax.random.split(k)
        scale = 1.0 / jnp.sqrt(cin)
        w = jax.random.uniform(kw, (cin, cout), jnp.float32, -scale, scale)
        b = jax.random.uniform(kb, (1, cout), jnp.float32, -scale, scale)
        return w, b

    pw16, pb16 = init_conv1x1(ks[3], g_dims[0], hidden)
    pw8, pb8 = init_conv1x1(ks[4], g_dims[1], hidden)
    pw4, pb4 = init_conv1x1(ks[5], g_dims[2], hidden)
    params = dict(w16=pw16, b16=pb16, w8=pw8, b8=pb8, w4=pw4, b4=pb4)

    ref = _reference(g16, g8, g4, params)

    # f32 compute path: tight check against the reference.
    out_f32 = jax.block_until_ready(
        feature_fuser(g16, g8, g4, params, compute_dtype=jnp.float32))
    assert out_f32.shape == (n, 3 * hidden, H16, W16), out_f32.shape
    assert jnp.allclose(out_f32, ref, atol=2e-2, rtol=2e-2)

    # Default bf16 compute path (halves the dominant HBM streams): looser tol.
    out_bf16 = jax.block_until_ready(feature_fuser(g16, g8, g4, params))
    assert out_bf16.shape == (n, 3 * hidden, H16, W16), out_bf16.shape
    assert jnp.allclose(out_bf16, ref, atol=5e-2, rtol=5e-2)

    print("KERNEL_OK")
</pallas_src>

<mosaic_0001>
module attributes {stable_mosaic.version = 11 : i64} {
  func.func @_fuser_kernel(%arg0: i32, %arg1: i32, %arg2: memref<1x16x24xf32, #tpu.memory_space<vmem>>, %arg3: memref<1x16x64xf32, #tpu.memory_space<vmem>>, %arg4: memref<1x16x272xf32, #tpu.memory_space<vmem>>, %arg5: memref<24x8xf32, #tpu.memory_space<vmem>>, %arg6: memref<1x8xf32, #tpu.memory_space<vmem>>, %arg7: memref<64x8xf32, #tpu.memory_space<vmem>>, %arg8: memref<1x8xf32, #tpu.memory_space<vmem>>, %arg9: memref<272x8xf32, #tpu.memory_space<vmem>>, %arg10: memref<1x8xf32, #tpu.memory_space<vmem>>, %arg11: memref<1x16x24xf32, #tpu.memory_space<vmem>>) attributes {dimension_semantics = [#tpu.dimension_semantics<parallel>, #tpu.dimension_semantics<parallel>], iteration_bounds = array<i64: 2, 1>, scalar_prefetch = 0 : i64, scratch_operands = 0 : i64, tpu.core_type = #tpu.core_type<tc>, window_params = [{transform_indices = @transform_0, window_bounds = array<i64: 1, 16, 24>}, {transform_indices = @transform_1, window_bounds = array<i64: 1, 16, 64>}, {transform_indices = @transform_2, window_bounds = array<i64: 1, 16, 272>}, {pipeline_mode = #tpu.pipeline_mode<synchronous>, transform_indices = @transform_3, window_bounds = array<i64: 24, 8>}, {pipeline_mode = #tpu.pipeline_mode<synchronous>, transform_indices = @transform_4, window_bounds = array<i64: 1, 8>}, {pipeline_mode = #tpu.pipeline_mode<synchronous>, transform_indices = @transform_5, window_bounds = array<i64: 64, 8>}, {pipeline_mode = #tpu.pipeline_mode<synchronous>, transform_indices = @transform_6, window_bounds = array<i64: 1, 8>}, {pipeline_mode = #tpu.pipeline_mode<synchronous>, transform_indices = @transform_7, window_bounds = array<i64: 272, 8>}, {pipeline_mode = #tpu.pipeline_mode<synchronous>, transform_indices = @transform_8, window_bounds = array<i64: 1, 8>}, {transform_indices = @transform_9, window_bounds = array<i64: 1, 16, 24>}]} {
    %c0 = arith.constant 0 : index
    %c0_0 = arith.constant 0 : index
    %c0_1 = arith.constant 0 : index
    %0 = vector.load %arg2[%c0, %c0_0, %c0_1] : memref<1x16x24xf32, #tpu.memory_space<vmem>>, vector<1x16x24xf32>
    %1 = vector.shape_cast %0 : vector<1x16x24xf32> to vector<16x24xf32>
    %c0_2 = arith.constant 0 : index
    %c0_3 = arith.constant 0 : index
    %2 = vector.load %arg5[%c0_2, %c0_3] : memref<24x8xf32, #tpu.memory_space<vmem>>, vector<24x8xf32>
    %cst = arith.constant dense<0.000000e+00> : vector<16x8xf32>
    %3 = tpu.matmul %1, %2, %cst {dimension_numbers = #tpu.dot_dimension_numbers<[1], [0], [0], [1], [0, 0, 1, 1], [], []>} : vector<16x24xf32>, vector<24x8xf32>, vector<16x8xf32> -> vector<16x8xf32>
    %c0_4 = arith.constant 0 : index
    %c0_5 = arith.constant 0 : index
    %4 = vector.load %arg6[%c0_4, %c0_5] : memref<1x8xf32, #tpu.memory_space<vmem>>, vector<1x8xf32>
    %5 = vector.broadcast %4 : vector<1x8xf32> to vector<16x8xf32>
    %6 = arith.addf %3, %5 : vector<16x8xf32>
    %c0_6 = arith.constant 0 : index
    %c0_7 = arith.constant 0 : index
    %c0_8 = arith.constant 0 : index
    %7 = vector.load %arg11[%c0_6, %c0_7, %c0_8] : memref<1x16x24xf32, #tpu.memory_space<vmem>>, vector<1x16x8xf32>
    %8 = vector.shape_cast %7 : vector<1x16x8xf32> to vector<16x8xf32>
    %9 = vector.shape_cast %6 : vector<16x8xf32> to vector<1x16x8xf32>
    tpu.vector_store %arg11[%c0_6, %c0_7, %c0_8], %9 {strides = array<i32>} : memref<1x16x24xf32, #tpu.memory_space<vmem>>, vector<1x16x8xf32>,
    %c0_9 = arith.constant 0 : index
    %c0_10 = arith.constant 0 : index
    %c0_11 = arith.constant 0 : index
    %10 = vector.load %arg3[%c0_9, %c0_10, %c0_11] : memref<1x16x64xf32, #tpu.memory_space<vmem>>, vector<1x16x64xf32>
    %11 = vector.shape_cast %10 : vector<1x16x64xf32> to vector<16x64xf32>
    %c0_12 = arith.constant 0 : index
    %c0_13 = arith.constant 0 : index
    %12 = vector.load %arg7[%c0_12, %c0_13] : memref<64x8xf32, #tpu.memory_space<vmem>>, vector<64x8xf32>
    %cst_14 = arith.constant dense<0.000000e+00> : vector<16x8xf32>
    %13 = tpu.matmul %11, %12, %cst_14 {dimension_numbers = #tpu.dot_dimension_numbers<[1], [0], [0], [1], [0, 0, 1, 1], [], []>} : vector<16x64xf32>, vector<64x8xf32>, vector<16x8xf32> -> vector<16x8xf32>
    %c0_15 = arith.constant 0 : index
    %c0_16 = arith.constant 0 : index
    %14 = vector.load %arg8[%c0_15, %c0_16] : memref<1x8xf32, #tpu.memory_space<vmem>>, vector<1x8xf32>
    %15 = vector.broadcast %14 : vector<1x8xf32> to vector<16x8xf32>
    %16 = arith.addf %13, %15 : vector<16x8xf32>
    %c0_17 = arith.constant 0 : index
    %c0_18 = arith.constant 0 : index
    %c8 = arith.constant 8 : index
    %17 = vector.load %arg11[%c0_17, %c0_18, %c8] : memref<1x16x24xf32, #tpu.memory_space<vmem>>, vector<1x16x8xf32>
    %18 = vector.shape_cast %17 : vector<1x16x8xf32> to vector<16x8xf32>
    %19 = vector.shape_cast %16 : vector<16x8xf32> to vector<1x16x8xf32>
    tpu.vector_store %arg11[%c0_17, %c0_18, %c8], %19 {strides = array<i32>} : memref<1x16x24xf32, #tpu.memory_space<vmem>>, vector<1x16x8xf32>,
    %c0_19 = arith.constant 0 : index
    %c0_20 = arith.constant 0 : index
    %c0_21 = arith.constant 0 : index
    %20 = vector.load %arg4[%c0_19, %c0_20, %c0_21] : memref<1x16x272xf32, #tpu.memory_space<vmem>>, vector<1x16x272xf32>
    %21 = vector.shape_cast %20 : vector<1x16x272xf32> to vector<16x272xf32>
    %c0_22 = arith.constant 0 : index
    %c0_23 = arith.constant 0 : index
    %22 = vector.load %arg9[%c0_22, %c0_23] : memref<272x8xf32, #tpu.memory_space<vmem>>, vector<272x8xf32>
    %cst_24 = arith.constant dense<0.000000e+00> : vector<16x8xf32>
    %23 = tpu.matmul %21, %22, %cst_24 {dimension_numbers = #tpu.dot_dimension_numbers<[1], [0], [0], [1], [0, 0, 1, 1], [], []>} : vector<16x272xf32>, vector<272x8xf32>, vector<16x8xf32> -> vector<16x8xf32>
    %c0_25 = arith.constant 0 : index
    %c0_26 = arith.constant 0 : index
    %24 = vector.load %arg10[%c0_25, %c0_26] : memref<1x8xf32, #tpu.memory_space<vmem>>, vector<1x8xf32>
    %25 = vector.broadcast %24 : vector<1x8xf32> to vector<16x8xf32>
    %26 = arith.addf %23, %25 : vector<16x8xf32>
    %c0_27 = arith.constant 0 : index
    %c0_28 = arith.constant 0 : index
    %c16 = arith.constant 16 : index
    %27 = vector.load %arg11[%c0_27, %c0_28, %c16] : memref<1x16x24xf32, #tpu.memory_space<vmem>>, vector<1x16x8xf32>
    %28 = vector.shape_cast %27 : vector<1x16x8xf32> to vector<16x8xf32>
    %29 = vector.shape_cast %26 : vector<16x8xf32> to vector<1x16x8xf32>
    tpu.vector_store %arg11[%c0_27, %c0_28, %c16], %29 {strides = array<i32>} : memref<1x16x24xf32, #tpu.memory_space<vmem>>, vector<1x16x8xf32>,
    return
  }
  func.func @transform_0(%arg0: i32, %arg1: i32) -> (i32, i32, i32) {
    %c0_i32 = arith.constant 0 : i32
    %c0_i32_0 = arith.constant 0 : i32
    return %arg0, %arg1, %c0_i32 : i32, i32, i32
  }
  func.func @transform_1(%arg0: i32, %arg1: i32) -> (i32, i32, i32) {
    %c0_i32 = arith.constant 0 : i32
    %c0_i32_0 = arith.constant 0 : i32
    return %arg0, %arg1, %c0_i32 : i32, i32, i32
  }
  func.func @transform_2(%arg0: i32, %arg1: i32) -> (i32, i32, i32) {
    %c0_i32 = arith.constant 0 : i32
    %c0_i32_0 = arith.constant 0 : i32
    return %arg0, %arg1, %c0_i32 : i32, i32, i32
  }
  func.func @transform_3(%arg0: i32, %arg1: i32) -> (i32, i32) {
    %c0_i32 = arith.constant 0 : i32
    %c0_i32_0 = arith.constant 0 : i32
    %c0_i32_1 = arith.constant 0 : i32
    return %c0_i32, %c0_i32_0 : i32, i32
  }
  func.func @transform_4(%arg0: i32, %arg1: i32) -> (i32, i32) {
    %c0_i32 = arith.constant 0 : i32
    %c0_i32_0 = arith.constant 0 : i32
    %c0_i32_1 = arith.constant 0 : i32
    return %c0_i32, %c0_i32_0 : i32, i32
  }
  func.func @transform_5(%arg0: i32, %arg1: i32) -> (i32, i32) {
    %c0_i32 = arith.constant 0 : i32
    %c0_i32_0 = arith.constant 0 : i32
    %c0_i32_1 = arith.constant 0 : i32
    return %c0_i32, %c0_i32_0 : i32, i32
  }
  func.func @transform_6(%arg0: i32, %arg1: i32) -> (i32, i32) {
    %c0_i32 = arith.constant 0 : i32
    %c0_i32_0 = arith.constant 0 : i32
    %c0_i32_1 = arith.constant 0 : i32
    return %c0_i32, %c0_i32_0 : i32, i32
  }
  func.func @transform_7(%arg0: i32, %arg1: i32) -> (i32, i32) {
    %c0_i32 = arith.constant 0 : i32
    %c0_i32_0 = arith.constant 0 : i32
    %c0_i32_1 = arith.constant 0 : i32
    return %c0_i32, %c0_i32_0 : i32, i32
  }
  func.func @transform_8(%arg0: i32, %arg1: i32) -> (i32, i32) {
    %c0_i32 = arith.constant 0 : i32
    %c0_i32_0 = arith.constant 0 : i32
    %c0_i32_1 = arith.constant 0 : i32
    return %c0_i32, %c0_i32_0 : i32, i32
  }
  func.func @transform_9(%arg0: i32, %arg1: i32) -> (i32, i32, i32) {
    %c0_i32 = arith.constant 0 : i32
    %c0_i32_0 = arith.constant 0 : i32
    return %arg0, %arg1, %c0_i32 : i32, i32, i32
  }
}

</mosaic_0001>

<bundles_post_ra>
// kernel: tpu_custom_call.1
= control target key start
LH: loop header
LB: loop body
LE: loop exit
PB: predicated region body
PF: predicated region fallthrough
CT: control target
= control target key end

     0   :  { %s1602_s0 = inlined_call_operand.vmem [shape: f32[2,16,24], index: 0, kind: input, shape index: {}]   ;;  %s1603_s1 = inlined_call_operand.vmem [shape: f32[2,16,64], index: 1, kind: input, shape index: {}]   ;;  %s1604_s2 = inlined_call_operand.vmem [shape: f32[2,16,272], index: 2, kind: input, shape index: {}]   ;;  %s1605_s3 = inlined_call_operand.vmem [shape: f32[24,8], index: 3, kind: input, shape index: {}]   ;;  %s1606_s4 = inlined_call_operand.vmem [shape: f32[1,8], index: 4, kind: input, shape index: {}]   ;;  %s1607_s5 = inlined_call_operand.vmem [shape: f32[64,8], index: 5, kind: input, shape index: {}]   ;;  %s1608_s6 = inlined_call_operand.vmem [shape: f32[1,8], index: 6, kind: input, shape index: {}]   ;;  %s1609_s7 = inlined_call_operand.vmem [shape: f32[272,8], index: 7, kind: input, shape index: {}]   ;;  %s1610_s8 = inlined_call_operand.vmem [shape: f32[1,8], index: 8, kind: input, shape index: {}]   ;;  %s1611_s9 = inlined_call_operand.hbm [shape: f32[2,16,24], index: 9, kind: output, shape index: {}]  }
   0x1   :  { %1613 = sst [smem:[#allocation5_spill]] %s1602_s0 }
   0x2   :  { %1614 = sst [smem:[#allocation6_spill]] %s1605_s3 }
   0x3   :  { %14 = vsyncpa [#allocation3], 0 }
   0x4   :  { %16 = vsyncpa [#allocation3 + $0x1], 0  ;;  %s1304_s30 = smov 0   ;;  %s1306_s10 = smov 0  }
   0x5   :  { %s1308_s11 = smov 0   ;;  %s1310_s12 = smov 0  }
   0x6   :  { %s1312_s13 = smov 0   ;;  %s1314_s14 = smov 0  }
   0x7 LB: > { %s993_s15 = sadd.s32 4294967295, %s1248_s14   ;;  %s994_s16 = sadd.s32 4294967294, %s1248_s14   ;;  %s1248_s14 = sphi %s1314_s14, %s22_s14   ;;  %s1244_s13 = sphi %s1312_s13, %s1624_s13   ;;  %s1240_s12 = sphi %s1310_s12, %s1623_s12   ;;  %s1236_s11 = sphi %s1308_s11, %s1622_s11   ;;  %s1232_s10 = sphi %s1306_s10, %s1621_s10   ;;  %s1228_s30 = sphi %s1304_s30, %s1620_s30  }
   0x8   : > { %s34_s17 = sadd.s32 1, %s1244_s13  ;;  %s253_s18 = sadd.s32 1, %s1236_s11 }
   0x9   : > { %p36_p0 = scmp.ge.s32.totalorder %s34_s17, 2  ;;  %p263_p1 = scmp.ne.s32.totalorder %s1236_s11, %s1232_s10 }
   0xa   : > { %p264_p2 = scmp.eq.s32.totalorder %s993_s15, 1  ;;  %p269_p3 = scmp.ne.s32.totalorder %s1232_s10, %s1228_s30 }
   0xb   : > { %s1626_s17 = smov (%p36_p0, %s34_s17), 0  ;;  %p270_p5 = scmp.eq.s32.totalorder %s994_s16, 1 }
   0xc   : > { %p1344_p4 = por %p264_p2, %p263_p1  ;;  %s248_s20 = ssub.s32 %s1244_s13, %s1626_s17 }
   0xd   : > { %p997_p6 = scmp.ge.s32.totalorder %s1248_s14, 1  ;;  %p251_p7 = scmp.eq.s32.totalorder %s248_s20, 0 }
   0xe   : > { %p1351_p8 = por %p270_p5, %p269_p3  ;;  %p346_p9 = scmp.lt.s32.totalorder %s1248_s14, 3 }
   0xf   : > { %s1357_s22 = scalar_select %p251_p7, %s1236_s11, %s253_s18  }
  0x10   : > { %p347_p10 = pnand %p997_p6, %p346_p9 }
  0x11   : > { %p406_p11 = scmp.lt.s32.totalorder (!%p347_p10), %s1240_s12, 1  ;;  %s1617_s3 = sld [smem:[#allocation6_spill]] (!%p347_p10) }
  0x12   : > { %350 = sbr.rel (%p347_p10) target bundleno = 391 (0x187), region = 56  ;;  %s1618_s0 = sld [smem:[#allocation5_spill]] (!%p347_p10) }
  0x13   : > { %s402_s18 = sand.u32 (!%p347_p10), 1, %s1232_s10   ;;  %s1251_s16 = smov (!%p347_p10), 16  }
  0x17   : > { %v681_v0 = vld [vmem:[%s1609_s7 + $0xf8] sm:$0xff]  ;;  %v680_v2 = vld [vmem:[%s1609_s7 + $0xf0] sm:$0xff]  ;;  %v679_v5 = vld [vmem:[%s1609_s7 + $0xe8] sm:$0xff]  ;;  %s1382_s26 = scalar_select %p406_p11, %s1240_s12, 1  ;;  %vm449_vm0 = vcmask 195584   ;;  %vm551_vm1 = vcmask 523264  }
  0x18   : > { %v665_v1 = vld [vmem:[%s1609_s7 + $0x78] sm:$0xff]  ;;  %1036 = vmatprep.subr.mxu0 %v681_v0  ;;  %v664_v3 = vld [vmem:[%s1609_s7 + $0x70] sm:$0xff]  ;;  %v440_v6 = vld [vmem:[%s1617_s3 + $0x8] sm:$0xff]  ;;  %vm691_vm2 = vcmask 130048   ;;  %vm531_vm3 = vcmask 64512   ;;  %vm641_vm4 = vcmask 130112  }
  0x19   : > { %v441_v4 = vld [vmem:[%s1617_s3 + $0x10] sm:$0xff]  ;;  %1037 = vmatpush3.msra.mxu0 %v665_v1  ;;  %v663_v7 = vld [vmem:[%s1609_s7 + $0x68] sm:$0xff]  ;;  %v439_v8 = vld [vmem:[%s1617_s3] sm:$0xff]  ;;  %s1612_s20 = sshll.u32 %s1382_s26, 4  ;;  %s1113_s15 = smul.u32 48, %s1382_s26  ;;  %vm856_vm5 = vcmask 195712  }
  0x1a   : > { %1078 = vmatprep.subr.mxu1 %v441_v4  ;;  %1038 = vmatprep.subr.mxu0 %v680_v2  ;;  %v678_v9 = vld [vmem:[%s1609_s7 + $0xe0] sm:$0xff]  ;;  %s413_s28 = scalar_lea.vmem %s1618_s0, %s1612_s20  ;;  %v677_v11 = vld [vmem:[%s1609_s7 + $0xd8] sm:$0xff]  ;;  %v676_v16 = vld [vmem:[%s1609_s7 + $0xd0] sm:$0xff]  ;;  %s1619_s23 = sshll.u32 %s1382_s26, 4 }
  0x1b   : > { %1079 = vmatpush3.msra.mxu1 %v441_v4  ;;  %1039 = vmatpush3.msra.mxu0 %v664_v3  ;;  %v662_v10 = vld [vmem:[%s1609_s7 + $0x60] sm:$0xff]  ;;  %v543_v13 = vld [vmem:[%s1607_s5 + $0x38] sm:$0xff]  ;;  %v438_v15 = vld [vmem:[%s413_s28 + $0x8] sm:$0xff]  ;;  %s423_s0 = scalar_lea.vmem %s1603_s1, %s1619_s23  ;;  %s1488_s25 = scalar_lea.vmem %s1604_s2, %s1113_s15 }
  0x1c   : > { %1080 = vmatprep.subr.mxu1 %v440_v6  ;;  %1040 = vmatprep.subr.mxu0 %v679_v5  ;;  %v437_v12 = vld [vmem:[%s413_s28] sm:$0xff]  ;;  %v661_v14 = vld [vmem:[%s1609_s7 + $0x58] sm:$0xff]  ;;  %v660_v17 = vld [vmem:[%s1609_s7 + $0x50] sm:$0xff]  ;;  %s998_s26 = sshll.u32 %s402_s18, 4  ;;  %s1250_s3 = smov 8  }
  0x1d   : > { %1081 = vmatpush3.msra.mxu1 %v440_v6  ;;  %1041 = vmatpush3.msra.mxu0 %v663_v7  ;;  %v542_v18 = vld [vmem:[%s1607_s5 + $0x30] sm:$0xff]  ;;  %v675_v19 = vld [vmem:[%s1609_s7 + $0xc8] sm:$0xff]  ;;  %v674_v22 = vld [vmem:[%s1609_s7 + $0xc0] sm:$0xff]  ;;  %s1529_s23 = scalar_lea.vmem [#allocation2], %s998_s26  ;;  %s1020_s15 = sshll.u32 %s1240_s12, 8 }
  0x1e   : > { %1082 = vmatprep.subr.mxu1 %v439_v8  ;;  %1042 = vmatprep.subr.mxu0 %v678_v9  ;;  %v659_v20 = vld [vmem:[%s1609_s7 + $0x48] sm:$0xff]  ;;  %v658_v23 = vld [vmem:[%s1609_s7 + $0x40] sm:$0xff]  ;;  %v673_v25 = vld [vmem:[%s1609_s7 + $0xb8] sm:$0xff]  ;;  %s875_s20 = sshll.u32 %s1529_s23, 4  ;;  %s1549_s28 = scalar_lea.hbm %s1611_s9, %s1020_s15  ;;  %s1551_s20 = int_to_ptr.vmem [resolvable:$true] %s875_s20 }
  0x1f   : > { %1083 = vmatpush3.msra.mxu1 %v439_v8  ;;  %1043 = vmatpush3.msra.mxu0 %v662_v10  ;;  %v541_v21 = vld [vmem:[%s1607_s5 + $0x28] sm:$0xff]  ;;  %v540_v24 = vld [vmem:[%s1607_s5 + $0x20] sm:$0xff]  ;;  %v657_v26 = vld [vmem:[%s1609_s7 + $0x38] sm:$0xff]  ;;  %s1172_s24 = scalar_lea.vmem %s1551_s20, 256  ;;  %s1252_s12 = smov [#allocation2]  }
  0x20   : > { %1084 = vmatprep.mubr.msk.f32.mxu1 %vm449_vm0, %v437_v12  ;;  %1044 = vmatprep.subr.mxu0 %v677_v11  ;;  %v539_v27 = vld [vmem:[%s1607_s5 + $0x18] sm:$0xff]  ;;  %v672_v28 = vld [vmem:[%s1609_s7 + $0xb0] sm:$0xff]  ;;  %v671_v31 = vld [vmem:[%s1609_s7 + $0xa8] sm:$0xff]  ;;  %p1173_p12 = scmp.ne.s32.totalorder %s1551_s20, %s1172_s24  ;;  %s1176_s27 = sshll.u32 %s1252_s12, 4  ;;  %s1177_s27 = int_to_ptr.vmem [resolvable:$false] %s1176_s27 }
  0x21   : > { %1087 = vmatprep.subr.mxu1 %v543_v13  ;;  %1045 = vmatpush3.msra.mxu0 %v661_v14  ;;  %v656_v29 = vld [vmem:[%s1609_s7 + $0x30] sm:$0xff]  ;;  %v655_v32 = vld [vmem:[%s1609_s7 + $0x28] sm:$0xff]  ;;  %v670_v34 = vld [vmem:[%s1609_s7 + $0xa0] sm:$0xff]  ;;  %s1178_s29 = scalar_lea.vmem %s1177_s27, 512  ;;  %p1179_p1 = scmp.lt.s32.totalorder %s1551_s20, %s1177_s27 }
  0x22   : > { %1085 = vmatmul.mubr.msk.f32.vlgmr.msra.gmra.mxu1 %vm449_vm0, %v438_v15  ;;  %1046 = vmatprep.subr.mxu0 %v676_v16  ;;  %v538_v30 = vld [vmem:[%s1607_s5 + $0x10] sm:$0xff]  ;;  %v537_v33 = vld [vmem:[%s1607_s5 + $0x8] sm:$0xff]  ;;  %v654_v35 = vld [vmem:[%s1609_s7 + $0x20] sm:$0xff]  ;;  %p1174_p13 = pnand %p1173_p12, %p1344_p4  ;;  %p1180_p2 = scmp.lt.s32.totalorder %s1178_s29, %s1172_s24 }
  0x23   : > { %1088 = vmatpush3.msra.mxu1 %v543_v13  ;;  %1047 = vmatpush3.msra.mxu0 %v660_v17  ;;  %v536_v36 = vld [vmem:[%s1607_s5] sm:$0xff]  ;;  %v669_v37 = vld [vmem:[%s1609_s7 + $0x98] sm:$0xff]  ;;  %v535_v40 = vld [vmem:[%s423_s0 + $0x8] sm:$0xff] }
  0x24   : > { %1089 = vmatprep.subr.mxu1 %v542_v18  ;;  %1048 = vmatprep.subr.mxu0 %v675_v19  ;;  %v534_v38 = vld [vmem:[%s423_s0] sm:$0xff]  ;;  %v653_v39 = vld [vmem:[%s1609_s7 + $0x18] sm:$0xff]  ;;  %v668_v41 = vld [vmem:[%s1609_s7 + $0x90] sm:$0xff]  ;;  %p1175_p0 = pneg %p1174_p13  ;;  %p1181_p3 = por %p1180_p2, %p1179_p1 }
  0x25   : > { %1090 = vmatpush3.msra.mxu1 %v542_v18  ;;  %1049 = vmatpush3.msra.mxu0 %v659_v20  ;;  %v652_v42 = vld [vmem:[%s1609_s7 + $0x10] sm:$0xff]  ;;  %v683_v43 = vld [vmem:[%s1609_s7 + $0x108] sm:$0xff]  ;;  %v666_v47 = vld [vmem:[%s1609_s7 + $0x80] sm:$0xff] }
  0x26   : > { %1091 = vmatprep.subr.mxu1 %v541_v21  ;;  %1050 = vmatprep.subr.mxu0 %v674_v22  ;;  %v667_v44 = vld [vmem:[%s1609_s7 + $0x88] sm:$0xff]  ;;  %v682_v48 = vld [vmem:[%s1609_s7 + $0x100] sm:$0xff]  ;;  %v646_v51 = vld [vmem:[%s1488_s25 + $0x10] sm:$0xff]  ;;  %p1182_p5 = pnand %p1181_p3, %p1175_p0 }
  0x27   : > { %1092 = vmatpush3.msra.mxu1 %v541_v21  ;;  %1051 = vmatpush3.msra.mxu0 %v658_v23  ;;  %v645_v45 = vld [vmem:[%s1488_s25 + $0x8] sm:$0xff]  ;;  %v650_v49 = vld [vmem:[%s1609_s7] sm:$0xff]  ;;  %v647_v54 = vld [vmem:[%s1488_s25 + $0x18] sm:$0xff] }
  0x28   : > { %1093 = vmatprep.subr.mxu1 %v540_v24  ;;  %1052 = vmatprep.subr.mxu0 %v673_v25  ;;  %v651_v46 = vld [vmem:[%s1609_s7 + $0x8] sm:$0xff]  ;;  %v644_v50 = vld [vmem:[%s1488_s25] sm:$0xff] }
  0x29   : > { %1094 = vmatpush3.msra.mxu1 %v540_v24  ;;  %1053 = vmatpush3.msra.mxu0 %v657_v26  ;;  %v649_v52 = vld [vmem:[%s1488_s25 + $0x28] sm:$0xff]  ;;  %v648_v53 = vld [vmem:[%s1488_s25 + $0x20] sm:$0xff]  ;;  %s1556_s25 = scalar_lea.sflag [#allocation3], %s402_s18 }
  0x2a   : > { %1095 = vmatprep.subr.mxu1 %v539_v27  ;;  %1054 = vmatprep.subr.mxu0 %v672_v28  ;;  %v1004_v55 = vld [vmem:[%s1606_s4] ss:$0 sm:$0xff] }
  0x2b   : > { %1096 = vmatpush3.msra.mxu1 %v539_v27  ;;  %1055 = vmatpush3.msra.mxu0 %v656_v29  ;;  %v1007_v61 = vld [vmem:[%s1608_s6] ss:$0 sm:$0xff] }
  0x2c   : > { %1097 = vmatprep.subr.mxu1 %v538_v30  ;;  %1056 = vmatprep.subr.mxu0 %v671_v31  ;;  %v1010_v4 = vld [vmem:[%s1610_s8] ss:$0 sm:$0xff] }
  0x2d   : > { %1098 = vmatpush3.msra.mxu1 %v538_v30  ;;  %1057 = vmatpush3.msra.mxu0 %v655_v32 }
  0x2e   : > { %1099 = vmatprep.subr.mxu1 %v537_v33  ;;  %1058 = vmatprep.subr.mxu0 %v670_v34 }
  0x2f   : > { %1100 = vmatpush3.msra.mxu1 %v537_v33  ;;  %1059 = vmatpush3.msra.mxu0 %v654_v35 }
  0x30   : > { %1101 = vmatprep.subr.mxu1 %v536_v36  ;;  %1060 = vmatprep.subr.mxu0 %v669_v37 }
  0x31   : > { %1102 = vmatpush3.msra.mxu1 %v536_v36  ;;  %1103 = vmatprep.mubr.msk.f32.mxu1 %vm551_vm1, %v534_v38 }
  0x32   : > { %1061 = vmatpush3.msra.mxu0 %v653_v39  ;;  %1104 = vmatmul.mubr.msk.f32.vlgmr.msra.gmra.mxu1 %vm551_vm1, %v535_v40 }
  0x33   : > { %1062 = vmatprep.subr.mxu0 %v668_v41  ;;  %1106 = vmatprep.subr.mxu1 %v683_v43 }
  0x34   : > { %1063 = vmatpush3.msra.mxu0 %v652_v42  ;;  %762 = vmatprep.mubr.f32.mxu0 %v645_v45 }
  0x35   : > { %1064 = vmatprep.subr.mxu0 %v667_v44  ;;  %1107 = vmatpush3.msra.mxu1 %v683_v43 }
  0x36   : > { %1065 = vmatpush3.msra.mxu0 %v651_v46  ;;  %1108 = vmatprep.subr.mxu1 %v682_v48 }
  0x37   : > { %1066 = vmatprep.subr.mxu0 %v666_v47  ;;  %1109 = vmatpush3.msra.mxu1 %v682_v48 }
  0x38   : > { %1067 = vmatpush3.msra.mxu0 %v650_v49  ;;  %1110 = vmatprep.mubr.msk.f32.mxu1 %vm691_vm2, %v646_v51 }
  0x39   : > { %763 = vmatmul.mubr.f32.vlgmr.msra.gmra.mxu0 %v644_v50  ;;  %1111 = vmatmul.mubr.msk.f32.vlgmr.msra.gmra.mxu1 %vm691_vm2, %v649_v52 }
  0x3a   : > { %767 = vmatprep.mubr.f32.mxu0 %v648_v53 }
  0x3d   : > { %768 = vmatmul.mubr.f32.gmra.mxu0 %v647_v54 }
  0xe2   : > { %v1086_v56 = vpop.f32.mrf.mxu1 }
  0xe3   : > { %v528_v57 = vadd.f32 %v1086_v56, %v1004_v55 }
  0xe4   : > { %v522_v58 = vpop.f32.mrf.mxu1 }
  0xe5   : > { %533 = vst.msk [vmem:[%s1529_s23 + $0x8] sm:$0xff] %vm531_vm3, %v528_v57  ;;  %v523_v59 = vadd.f32 %v1004_v55, %v522_v58 }
  0xe7   : > { %532 = vst.msk [vmem:[%s1529_s23] sm:$0xff] %vm531_vm3, %v523_v59 }
  0xf2   : > { %v1105_v60 = vpop.f32.mrf.mxu1 }
  0xf3   : > { %v630_v0 = vadd.f32 %v1105_v60, %v1007_v61 }
  0xf4   : > { %v624_v62 = vpop.f32.mrf.mxu1 }
  0xf5   : > { %v625_v63 = vadd.f32 %v1007_v61, %v624_v62 }
  0xf7   : > { %635 = vrot.lane.b32.xlu0 %v625_v63, %s1250_s3 }
  0xf9   : > { %v1068_v1 = vpop.f32.mrf.mxu0  ;;  %v1112_v3 = vpop.f32.mrf.mxu1 }
  0xfb   : > { %v1069_v2 = vpop.f32.mrf.mxu0  ;;  %637 = vrot.lane.b32.xlu0 %v630_v0, %s1250_s3  ;;  %v839_v8 = vpop.f32.mrf.mxu1 }
  0xfc   : > { %v1070_v5 = vadd.f32 %v1069_v2, %v1068_v1 }
  0xfd   : > { %v1071_v6 = vpop.f32.mrf.mxu0 }
  0xfe   : > { %v765_v7 = vadd.f32 %v1070_v5, %v1010_v4 }
  0xff   : > { %v1072_v9 = vpop.f32.mrf.mxu0 }
 0x100   : > { %v840_v10 = vadd.f32 %v839_v8, %v765_v7  ;;  %v1073_v11 = vadd.f32 %v1072_v9, %v1071_v6 }
 0x102   : > { %v770_v12 = vadd.f32 %v1073_v11, %v1010_v4  ;;  %850 = vrot.lane.b32.xlu1 %v840_v10, %s1251_s16 }
 0x104   : > { %v845_v13 = vadd.f32 %v1112_v3, %v770_v12 }
 0x106   : > { %852 = vrot.lane.b32.xlu1 %v845_v13, %s1251_s16 }
 0x169   : > { %v636_v14 = vpop.permute.xlu0 %635 }
 0x16a   : > { %642 = vst.msk [vmem:[%s1529_s23] sm:$0xff] %vm641_vm4, %v636_v14 }
 0x16d   : > { %v638_v15 = vpop.permute.xlu0 %637 }
 0x16e   : > { %643 = vst.msk [vmem:[%s1529_s23 + $0x8] sm:$0xff] %vm641_vm4, %v638_v15 }
 0x174   : > { %v851_v16 = vpop.permute.xlu1 %850 }
 0x175   : > { %857 = vst.msk [vmem:[%s1529_s23] sm:$0xff] %vm856_vm5, %v851_v16 }
 0x178   : > { %v853_v17 = vpop.permute.xlu1 %852 }
 0x179   : > { %858 = vst.msk [vmem:[%s1529_s23 + $0x8] sm:$0xff] %vm856_vm5, %v853_v17 }
 0x17a   : > { %1185 = shalt.err (!%p1182_p5)
}
 0x17b   : > { %s1186_s18 = scalar_lea.hbm %s1549_s28, 256  ;;  %s1190_s15 = scalar_lea.hbm %s1611_s9, 512 }
 0x17c   : > { %p1187_p6 = scmp.ne.s32.totalorder %s1549_s28, %s1186_s18  ;;  %p1191_p10 = scmp.lt.s32.totalorder %s1549_s28, %s1611_s9 }
 0x17d   : > { %p1192_p11 = scmp.lt.s32.totalorder %s1190_s15, %s1186_s18 }
 0x17e   : > { %p1188_p7 = pnand %p1187_p6, %p1344_p4 }
 0x17f   : > { %p1193_p12 = por %p1192_p11, %p1191_p10 }
 0x180   : > { %p1189_p9 = pneg %p1188_p7 }
 0x182   : > { %p1194_p13 = pnand %p1193_p12, %p1189_p9 }
 0x184   : > { %1197 = shalt.err (!%p1194_p13)
}
 0x185   : > { %s1253_s24 = smov 128  }
 0x186   : > { %1114 = dma.vmem_to_hbm [thread:$0]  (%p1344_p4), %s1551_s20, 256, %s1549_s28, %s1556_s25, %s1253_s24, %s1253_s24, %s1250_s3  }
 0x187 PF: > { %p1120_p0 = scmp.ge.s32.totalorder %s1248_s14, 2  ;;  %s890_s12 = sand.u32 1, %s1228_s30  }
 0x188   : > { %s891_s27 = scalar_lea.sflag [#allocation3], %s890_s12 }
 0x189   : > { %p1117_p1 = pnand %p1120_p0, %p1351_p8 }
 0x18b   : > { %p1118_p2 = pneg %p1117_p1 }
 0x18d   : > { %1223 = dma.done.wait (%p1118_p2), %s891_s27, 256  }
 0x18e   : > { %1225 = vsyncadd (%p1118_p2), %s891_s27, 4294967040  ;;  %s22_s14 = sadd.s32 1, %s1248_s14   ;;  %s1620_s30 = smov %s1232_s10 }
 0x18f   : > { %p19_p3 = scmp.ge.s32.totalorder %s22_s14, 4   ;;  %s1621_s10 = smov %s1236_s11 }
 0x190   : > { %s1622_s11 = smov %s1357_s22  ;;  %s1623_s12 = smov %s1244_s13 }
 0x191   : > { %s1624_s13 = smov %s1626_s17  ;;  %21 = sbr.rel (!%p19_p3) target bundleno = 7 (0x7), region = 97 }
 0x196   :  { %896 = vsyncpa [#allocation3], 1 }
 0x197   :  { %898 = vsyncpa [#allocation3 + $0x1], 1 }

</bundles_post_ra>
